<compile_context>
chip_gen: v6e
topology: v6e:2x2x1
jax: 0.10.0
libtpu: 0.0.40
codegen_flags: <defaults>
</compile_context>

<pallas_src>
import functools

import jax
import jax.numpy as jnp
from jax import lax
from jax.experimental import pallas as pl
from jax.experimental.pallas import tpu as pltpu

LN_EPS = 1e-5  # torch.nn.LayerNorm default


def _pick_tile_rows(total_rows, d_in, d_out, *, max_rows=1024,
                    vmem_budget_bytes=8 << 20):
    """Largest divisor of total_rows that is <= max_rows and keeps the
    double-buffered f32 x-in + out tiles under the VMEM budget."""
    bytes_per_row = 4 * (d_in + d_out) * 2  # f32, double-buffered in + out
    cap = max(1, min(max_rows, vmem_budget_bytes // max(bytes_per_row, 1)))
    cap = min(cap, total_rows)
    best = 1
    for t in range(1, cap + 1):
        if total_rows % t == 0:
            best = t
    return best


_COMPILER_PARAMS = pltpu.CompilerParams(
    dimension_semantics=("parallel",),
    vmem_limit_bytes=48 << 20,  # headroom over 32 MiB default; < v7x 64 MiB phys
)


# ---------------------- Fused PreNorm(LayerNorm) + Linear --------------------
def _prenorm_linear_kernel(x_ref, gamma_ref, beta_ref, w_ref, b_ref, o_ref):
    # LayerNorm over the last axis (f32 stats, biased variance, like torch).
    x = x_ref[...].astype(jnp.float32)                 # (tile_rows, D)
    mean = jnp.mean(x, axis=-1, keepdims=True)
    centered = x - mean
    var = jnp.mean(centered * centered, axis=-1, keepdims=True)
    inv = lax.rsqrt(var + LN_EPS)
    normed = (centered * inv) * gamma_ref[...].astype(jnp.float32) \
        + beta_ref[...].astype(jnp.float32)
    # fn = Linear, straight off VMEM — no HBM round-trip of `normed`.
    acc = jnp.dot(normed.astype(w_ref.dtype), w_ref[...],
                  preferred_element_type=jnp.float32)
    o_ref[...] = (acc + b_ref[...].astype(jnp.float32)).astype(o_ref.dtype)


def prenorm_linear_pallas(x, gamma, beta, w, b, *, tile_rows=None):
    """Fused fn(LayerNorm(x)) with fn = Linear(w, b).  x: (B, N, D) -> (B, N, H)."""
    B, N, D = x.shape
    H = w.shape[1]
    R = B * N
    x2d = x.reshape(R, D)
    if tile_rows is None:
        tile_rows = _pick_tile_rows(R, D, H)
    assert R % tile_rows == 0
    out2d = pl.pallas_call(
        _prenorm_linear_kernel,
        out_shape=jax.ShapeDtypeStruct((R, H), x.dtype),
        grid_spec=pl.GridSpec(
            grid=(R // tile_rows,),
            in_specs=[
                pl.BlockSpec((tile_rows, D), lambda i: (i, 0)),  # x rows, streamed
                pl.BlockSpec((1, D), lambda i: (0, 0)),          # gamma (resident)
                pl.BlockSpec((1, D), lambda i: (0, 0)),          # beta  (resident)
                pl.BlockSpec((D, H), lambda i: (0, 0)),          # W     (resident)
                pl.BlockSpec((1, H), lambda i: (0, 0)),          # bias  (resident)
            ],
            out_specs=pl.BlockSpec((tile_rows, H), lambda i: (i, 0)),
        ),
        compiler_params=_COMPILER_PARAMS,
    )(x2d, gamma.reshape(1, D), beta.reshape(1, D), w, b.reshape(1, H))
    return out2d.reshape(B, N, H)


# ------------------- Standalone LayerNorm (for arbitrary fn) -----------------
def _layernorm_kernel(x_ref, gamma_ref, beta_ref, o_ref):
    x = x_ref[...].astype(jnp.float32)
    mean = jnp.mean(x, axis=-1, keepdims=True)
    centered = x - mean
    var = jnp.mean(centered * centered, axis=-1, keepdims=True)
    inv = lax.rsqrt(var + LN_EPS)
    y = centered * inv * gamma_ref[...].astype(jnp.float32) \
        + beta_ref[...].astype(jnp.float32)
    o_ref[...] = y.astype(o_ref.dtype)


def layernorm_pallas(x2d, gamma, beta, *, tile_rows=None):
    R, D = x2d.shape
    if tile_rows is None:
        tile_rows = _pick_tile_rows(R, D, D)
    assert R % tile_rows == 0
    return pl.pallas_call(
        _layernorm_kernel,
        out_shape=jax.ShapeDtypeStruct((R, D), x2d.dtype),
        grid_spec=pl.GridSpec(
            grid=(R // tile_rows,),
            in_specs=[
                pl.BlockSpec((tile_rows, D), lambda i: (i, 0)),
                pl.BlockSpec((1, D), lambda i: (0, 0)),
                pl.BlockSpec((1, D), lambda i: (0, 0)),
            ],
            out_specs=pl.BlockSpec((tile_rows, D), lambda i: (i, 0)),
        ),
        compiler_params=_COMPILER_PARAMS,
    )(x2d, gamma.reshape(1, D), beta.reshape(1, D))


def prenorm_apply(x, fn, gamma, beta, *, tile_rows=None):
    """General PreNorm.forward: fn(LayerNorm(x)) for an arbitrary callable fn."""
    B, N, D = x.shape
    normed = layernorm_pallas(x.reshape(B * N, D), gamma, beta,
                              tile_rows=tile_rows)
    out2d = fn(normed)
    return out2d.reshape(B, N, out2d.shape[-1])


if __name__ == "__main__":
    # CoAtNet transformer-stage-like shapes; D = H = 128 keeps the kernel
    # lane-dense (full 128-lane vregs) and gives the MXU an M-tile >= 128.
    B, N, D, H = 2, 64, 128, 128  # batch, tokens (8x8 spatial), channels, fn out

    key = jax.random.PRNGKey(0)
    kx, kw, kb = jax.random.split(key, 3)
    x = jax.random.normal(kx, (B, N, D), dtype=jnp.float32)

    # LayerNorm affine init (like torch) + a small Linear as the wrapped `fn`.
    gamma = jnp.ones((D,), dtype=jnp.float32)
    beta = jnp.zeros((D,), dtype=jnp.float32)
    w_fn = jax.random.normal(kw, (D, H), dtype=jnp.float32) * 0.02
    b_fn = jax.random.normal(kb, (H,), dtype=jnp.float32) * 0.02

    # Fused PreNorm(LayerNorm) + Linear — the main (optimized) path.
    fused = jax.jit(
        lambda a: prenorm_linear_pallas(a, gamma, beta, w_fn, b_fn)
    )(x)
    jax.block_until_ready(fused)

    # Generic path (standalone LN kernel + arbitrary fn) — semantics check.
    fn = functools.partial(
        lambda n, w, b: n @ w + b, w=w_fn, b=b_fn)  # plain-JAX fn stand-in
    generic = jax.jit(
        lambda a: prenorm_apply(a, fn, gamma, beta)
    )(x)
    jax.block_until_ready(generic)

    # Pure-JAX reference of fn(LayerNorm(x)).
    x32 = x.astype(jnp.float32)
    mean = jnp.mean(x32, axis=-1, keepdims=True)
    var = jnp.mean((x32 - mean) ** 2, axis=-1, keepdims=True)
    ref_norm = (x32 - mean) / jnp.sqrt(var + LN_EPS) * gamma + beta
    ref = (ref_norm.reshape(B * N, D) @ w_fn + b_fn).reshape(B, N, H)

    assert jnp.allclose(fused, ref, atol=1e-4, rtol=1e-4)
    assert jnp.allclose(generic, ref, atol=1e-4, rtol=1e-4)

    print("KERNEL_OK")
</pallas_src>

<mosaic_0001>
module attributes {stable_mosaic.version = 11 : i64} {
  func.func @_prenorm_linear_kernel(%arg0: i32, %arg1: memref<128x128xf32, #tpu.memory_space<vmem>>, %arg2: memref<1x128xf32, #tpu.memory_space<vmem>>, %arg3: memref<1x128xf32, #tpu.memory_space<vmem>>, %arg4: memref<128x128xf32, #tpu.memory_space<vmem>>, %arg5: memref<1x128xf32, #tpu.memory_space<vmem>>, %arg6: memref<128x128xf32, #tpu.memory_space<vmem>>) attributes {dimension_semantics = [#tpu.dimension_semantics<parallel>], iteration_bounds = array<i64: 1>, scalar_prefetch = 0 : i64, scratch_operands = 0 : i64, tpu.core_type = #tpu.core_type<tc>, window_params = [{transform_indices = @transform_0, window_bounds = array<i64: 128, 128>}, {pipeline_mode = #tpu.pipeline_mode<synchronous>, transform_indices = @transform_1, window_bounds = array<i64: 1, 128>}, {pipeline_mode = #tpu.pipeline_mode<synchronous>, transform_indices = @transform_2, window_bounds = array<i64: 1, 128>}, {pipeline_mode = #tpu.pipeline_mode<synchronous>, transform_indices = @transform_3, window_bounds = array<i64: 128, 128>}, {pipeline_mode = #tpu.pipeline_mode<synchronous>, transform_indices = @transform_4, window_bounds = array<i64: 1, 128>}, {transform_indices = @transform_5, window_bounds = array<i64: 128, 128>}]} {
    %c0 = arith.constant 0 : index
    %c0_0 = arith.constant 0 : index
    %0 = vector.load %arg1[%c0, %c0_0] : memref<128x128xf32, #tpu.memory_space<vmem>>, vector<128x128xf32>
    %cst = arith.constant dense<0.000000e+00> : vector<128xf32>
    %1 = vector.multi_reduction <add>, %0, %cst [1] : vector<128x128xf32> to vector<128xf32>
    %2 = vector.shape_cast %1 : vector<128xf32> to vector<128x1xf32>
    %cst_1 = arith.constant 1.280000e+02 : f32
    %3 = vector.broadcast %cst_1 : f32 to vector<128x1xf32>
    %4 = arith.divf %2, %3 : vector<128x1xf32>
    %5 = vector.broadcast %4 : vector<128x1xf32> to vector<128x128xf32>
    %6 = arith.subf %0, %5 : vector<128x128xf32>
    %7 = arith.mulf %6, %6 : vector<128x128xf32>
    %cst_2 = arith.constant dense<0.000000e+00> : vector<128xf32>
    %8 = vector.multi_reduction <add>, %7, %cst_2 [1] : vector<128x128xf32> to vector<128xf32>
    %9 = vector.shape_cast %8 : vector<128xf32> to vector<128x1xf32>
    %cst_3 = arith.constant 1.280000e+02 : f32
    %10 = vector.broadcast %cst_3 : f32 to vector<128x1xf32>
    %11 = arith.divf %9, %10 : vector<128x1xf32>
    %cst_4 = arith.constant 9.99999974E-6 : f32
    %12 = vector.broadcast %cst_4 : f32 to vector<128x1xf32>
    %13 = arith.addf %11, %12 : vector<128x1xf32>
    %14 = math.rsqrt %13 : vector<128x1xf32>
    %15 = vector.broadcast %14 : vector<128x1xf32> to vector<128x128xf32>
    %16 = arith.mulf %6, %15 : vector<128x128xf32>
    %c0_5 = arith.constant 0 : index
    %c0_6 = arith.constant 0 : index
    %17 = vector.load %arg2[%c0_5, %c0_6] : memref<1x128xf32, #tpu.memory_space<vmem>>, vector<1x128xf32>
    %18 = vector.broadcast %17 : vector<1x128xf32> to vector<128x128xf32>
    %19 = arith.mulf %16, %18 : vector<128x128xf32>
    %c0_7 = arith.constant 0 : index
    %c0_8 = arith.constant 0 : index
    %20 = vector.load %arg3[%c0_7, %c0_8] : memref<1x128xf32, #tpu.memory_space<vmem>>, vector<1x128xf32>
    %21 = vector.broadcast %20 : vector<1x128xf32> to vector<128x128xf32>
    %22 = arith.addf %19, %21 : vector<128x128xf32>
    %c0_9 = arith.constant 0 : index
    %c0_10 = arith.constant 0 : index
    %23 = vector.load %arg4[%c0_9, %c0_10] : memref<128x128xf32, #tpu.memory_space<vmem>>, vector<128x128xf32>
    %cst_11 = arith.constant dense<0.000000e+00> : vector<128x128xf32>
    %24 = tpu.matmul %22, %23, %cst_11 {dimension_numbers = #tpu.dot_dimension_numbers<[1], [0], [0], [1], [0, 0, 1, 1], [], []>} : vector<128x128xf32>, vector<128x128xf32>, vector<128x128xf32> -> vector<128x128xf32>
    %c0_12 = arith.constant 0 : index
    %c0_13 = arith.constant 0 : index
    %25 = vector.load %arg5[%c0_12, %c0_13] : memref<1x128xf32, #tpu.memory_space<vmem>>, vector<1x128xf32>
    %26 = vector.broadcast %25 : vector<1x128xf32> to vector<128x128xf32>
    %27 = arith.addf %24, %26 : vector<128x128xf32>
    %c0_14 = arith.constant 0 : index
    %c0_15 = arith.constant 0 : index
    %28 = vector.load %arg6[%c0_14, %c0_15] : memref<128x128xf32, #tpu.memory_space<vmem>>, vector<128x128xf32>
    tpu.vector_store %arg6[%c0_14, %c0_15], %27 {strides = array<i32>} : memref<128x128xf32, #tpu.memory_space<vmem>>, vector<128x128xf32>,
    return
  }
  func.func @transform_0(%arg0: i32) -> (i32, i32) {
    %c0_i32 = arith.constant 0 : i32
    %c0_i32_0 = arith.constant 0 : i32
    return %arg0, %c0_i32 : i32, i32
  }
  func.func @transform_1(%arg0: i32) -> (i32, i32) {
    %c0_i32 = arith.constant 0 : i32
    %c0_i32_0 = arith.constant 0 : i32
    %c0_i32_1 = arith.constant 0 : i32
    return %c0_i32, %c0_i32_0 : i32, i32
  }
  func.func @transform_2(%arg0: i32) -> (i32, i32) {
    %c0_i32 = arith.constant 0 : i32
    %c0_i32_0 = arith.constant 0 : i32
    %c0_i32_1 = arith.constant 0 : i32
    return %c0_i32, %c0_i32_0 : i32, i32
  }
  func.func @transform_3(%arg0: i32) -> (i32, i32) {
    %c0_i32 = arith.constant 0 : i32
    %c0_i32_0 = arith.constant 0 : i32
    %c0_i32_1 = arith.constant 0 : i32
    return %c0_i32, %c0_i32_0 : i32, i32
  }
  func.func @transform_4(%arg0: i32) -> (i32, i32) {
    %c0_i32 = arith.constant 0 : i32
    %c0_i32_0 = arith.constant 0 : i32
    %c0_i32_1 = arith.constant 0 : i32
    return %c0_i32, %c0_i32_0 : i32, i32
  }
  func.func @transform_5(%arg0: i32) -> (i32, i32) {
    %c0_i32 = arith.constant 0 : i32
    %c0_i32_0 = arith.constant 0 : i32
    return %arg0, %c0_i32 : i32, i32
  }
}

</mosaic_0001>

<bundles_post_ra>
// kernel: _lambda_.1
= control target key start
LH: loop header
LB: loop body
LE: loop exit
PB: predicated region body
PF: predicated region fallthrough
CT: control target
= control target key end

     0   :  { %10 = vsyncpa [#allocation3], 0  ;;  %s926_s0 = inlined_call_operand.hbm [shape: f32[128,128], index: 0, kind: input, shape index: {}]   ;;  %s927_s1 = inlined_call_operand.vmem [shape: f32[1,128], index: 1, kind: input, shape index: {}]   ;;  %s928_s2 = inlined_call_operand.vmem [shape: f32[1,128], index: 2, kind: input, shape index: {}]   ;;  %s929_s3 = inlined_call_operand.hbm [shape: f32[128,128], index: 3, kind: input, shape index: {}]   ;;  %s930_s4 = inlined_call_operand.vmem [shape: f32[1,128], index: 4, kind: input, shape index: {}]   ;;  %s931_s5 = inlined_call_operand.hbm [shape: f32[128,128], index: 5, kind: output, shape index: {}]  }
   0x1   :  { %11 = vsyncpa [#allocation6], 0 }
   0x2   :  { %12 = vsyncpa [#allocation4], 0  ;;  %s716_s18 = smov [#allocation2]  }
   0x3   :  { %s18_s19 = sshll.u32 %s716_s18, 4  ;;  %s19_s19 = int_to_ptr.vmem [resolvable:$true] %s18_s19 }
   0x4   :  { %s658_s20 = scalar_lea.vmem %s19_s19, 2048  ;;  %p663_p1 = scmp.lt.s32.totalorder %s19_s19, %s19_s19 }
   0x5   :  { %p659_p0 = scmp.ne.s32.totalorder %s19_s19, %s658_s20  ;;  %p664_p2 = scmp.lt.s32.totalorder %s658_s20, %s658_s20 }
   0x7   :  { %p665_p3 = por %p664_p2, %p663_p1 }
   0x9   :  { %p666_p4 = pnand %p665_p3, %p659_p0 }
   0xb   :  { %669 = shalt.err (!%p666_p4)
}
   0xc   :  { %s717_s21 = smov 128   ;;  %s718_s22 = smov 8  }
   0xd   :  { %24 = dma.hbm_to_vmem [thread:$0]  %s926_s0, 2048, %s19_s19, [#allocation3], %s717_s21, %s717_s21, %s718_s22  }
   0xe   :  { %s719_s25 = smov [#allocation5]  }
   0xf   :  { %s34_s26 = sshll.u32 %s719_s25, 4  ;;  %s35_s26 = int_to_ptr.vmem [resolvable:$true] %s34_s26 }
  0x10   :  { %s678_s27 = scalar_lea.vmem %s35_s26, 2048  ;;  %p683_p6 = scmp.lt.s32.totalorder %s35_s26, %s35_s26 }
  0x11   :  { %p679_p5 = scmp.ne.s32.totalorder %s35_s26, %s678_s27  ;;  %p684_p7 = scmp.lt.s32.totalorder %s678_s27, %s678_s27 }
  0x13   :  { %p685_p8 = por %p684_p7, %p683_p6 }
  0x15   :  { %p686_p9 = pnand %p685_p8, %p679_p5 }
  0x17   :  { %689 = shalt.err (!%p686_p9)
}
  0x18   :  { %40 = dma.hbm_to_vmem [thread:$0]  %s929_s3, 2048, %s35_s26, [#allocation6], %s717_s21, %s717_s21, %s718_s22  }
  0x19   :  { %710 = dma.done.wait [#allocation3], 2048  }
  0x1a   :  { %711 = vsyncadd [#allocation3], 4294965248 }
  0x1b   :  { %712 = dma.done.wait [#allocation6], 2048  }
  0x1c   :  { %713 = vsyncadd [#allocation6], 4294965248  ;;  %v49_v0 = vld [vmem:[#allocation2] sm:$0xff]  ;;  %v50_v1 = vld [vmem:[#allocation2 + $0x8] sm:$0xff] }
  0x1d   :  { %65 = vadd.xlane.f32.xlu0 %v49_v0  ;;  %67 = vadd.xlane.f32.xlu1 %v50_v1  ;;  %v57_v2 = vld [vmem:[#allocation2 + $0x40] sm:$0xff]  ;;  %v58_v3 = vld [vmem:[#allocation2 + $0x48] sm:$0xff]  ;;  %v51_v4 = vld [vmem:[#allocation2 + $0x10] sm:$0xff] }
  0x1e   :  { %v59_v5 = vld [vmem:[#allocation2 + $0x50] sm:$0xff]  ;;  %v52_v6 = vld [vmem:[#allocation2 + $0x18] sm:$0xff]  ;;  %v763_v8 = vld [vmem:[#allocation2 + $0x20] sm:$0xff] }
  0x1f   :  { %v60_v7 = vld [vmem:[#allocation2 + $0x58] sm:$0xff]  ;;  %v765_v9 = vld [vmem:[#allocation2 + $0x60] sm:$0xff]  ;;  %v769_v10 = vld [vmem:[#allocation2 + $0x28] sm:$0xff] }
  0x20   :  { %v771_v11 = vld [vmem:[#allocation2 + $0x68] sm:$0xff]  ;;  %v775_v12 = vld [vmem:[#allocation2 + $0x30] sm:$0xff]  ;;  %v781_v14 = vld [vmem:[#allocation2 + $0x38] sm:$0xff] }
  0x21   :  { %81 = vadd.xlane.f32.xlu0 %v57_v2  ;;  %83 = vadd.xlane.f32.xlu1 %v58_v3  ;;  %v777_v13 = vld [vmem:[#allocation2 + $0x70] sm:$0xff]  ;;  %v783_v15 = vld [vmem:[#allocation2 + $0x78] sm:$0xff]  ;;  %v301_v50 = vld [vmem:[#allocation5 + $0x68] sm:$0xff] }
  0x22   :  { %v303_v16 = vld [vmem:[#allocation5 + $0x78] sm:$0xff]  ;;  %v302_v17 = vld [vmem:[#allocation5 + $0x70] sm:$0xff]  ;;  %v300_v54 = vld [vmem:[#allocation5 + $0x60] sm:$0xff] }
  0x23   :  { %525 = vmatprep.subr.mxu0 %v303_v16  ;;  %581 = vmatprep.subr.mxu1 %v303_v16  ;;  %v299_v63 = vld [vmem:[#allocation5 + $0x58] sm:$0xff] }
  0x24   :  { %526 = vmatpush3.msra.mxu0 %v303_v16  ;;  %597 = vmatpush3.msra.mxu1 %v303_v16 }
  0x25   :  { %69 = vadd.xlane.f32.xlu0 %v51_v4  ;;  %85 = vadd.xlane.f32.xlu1 %v59_v5 }
  0x26   :  { %527 = vmatprep.subr.mxu0 %v302_v17  ;;  %582 = vmatprep.subr.mxu1 %v302_v17 }
  0x27   :  { %528 = vmatpush3.msra.mxu0 %v302_v17  ;;  %598 = vmatpush3.msra.mxu1 %v302_v17  ;;  %v296_v17 = vld [vmem:[#allocation5 + $0x40] sm:$0xff] }
  0x28   :  { %529 = vmatprep.subr.mxu0 %v301_v50  ;;  %583 = vmatprep.subr.mxu1 %v301_v50 }
  0x29   :  { %71 = vadd.xlane.f32.xlu0 %v52_v6  ;;  %87 = vadd.xlane.f32.xlu1 %v60_v7 }
  0x2a   :  { %530 = vmatpush3.msra.mxu0 %v301_v50  ;;  %599 = vmatpush3.msra.mxu1 %v301_v50 }
  0x2b   :  { %531 = vmatprep.subr.mxu0 %v300_v54  ;;  %584 = vmatprep.subr.mxu1 %v300_v54 }
  0x2c   :  { %532 = vmatpush3.msra.mxu0 %v300_v54  ;;  %600 = vmatpush3.msra.mxu1 %v300_v54 }
  0x2d   :  { %73 = vadd.xlane.f32.xlu0 %v763_v8  ;;  %89 = vadd.xlane.f32.xlu1 %v765_v9 }
  0x2e   :  { %533 = vmatprep.subr.mxu0 %v299_v63  ;;  %585 = vmatprep.subr.mxu1 %v299_v63 }
  0x2f   :  { %534 = vmatpush3.msra.mxu0 %v299_v63  ;;  %601 = vmatpush3.msra.mxu1 %v299_v63 }
  0x31   :  { %75 = vadd.xlane.f32.xlu0 %v769_v10  ;;  %91 = vadd.xlane.f32.xlu1 %v771_v11 }
  0x35   :  { %77 = vadd.xlane.f32.xlu0 %v775_v12  ;;  %93 = vadd.xlane.f32.xlu1 %v777_v13 }
  0x39   :  { %79 = vadd.xlane.f32.xlu0 %v781_v14  ;;  %95 = vadd.xlane.f32.xlu1 %v783_v15 }
  0xa6   :  { %v66_v18 = vpop.xlane.xlu0 %65  ;;  %v68_v19 = vpop.xlane.xlu1 %67 }
  0xa7   :  { %v98_v20 = vmul.f32 0.0078125, %v66_v18  ;;  %v99_v21 = vmul.f32 0.0078125, %v68_v19 }
  0xa9   :  { %v787_v22 = vsub.f32 %v49_v0, %v98_v20  ;;  %v789_v23 = vsub.f32 %v50_v1, %v99_v21 }
  0xaa   :  { %v82_v24 = vpop.xlane.xlu0 %81  ;;  %v84_v25 = vpop.xlane.xlu1 %83 }
  0xab   :  { %v106_v26 = vmul.f32 0.0078125, %v82_v24  ;;  %v130_v27 = vmul.f32 %v787_v22, %v787_v22  ;;  %v107_v28 = vmul.f32 0.0078125, %v84_v25  ;;  %v131_v31 = vmul.f32 %v789_v23, %v789_v23 }
  0xad   :  { %v793_v29 = vsub.f32 %v57_v2, %v106_v26  ;;  %146 = vadd.xlane.f32.xlu0 %v130_v27  ;;  %v795_v30 = vsub.f32 %v58_v3, %v107_v28  ;;  %v298_v3 = vld [vmem:[#allocation5 + $0x50] sm:$0xff] }
  0xae   :  { %v70_v32 = vpop.xlane.xlu0 %69  ;;  %v86_v33 = vpop.xlane.xlu1 %85  ;;  %535 = vmatprep.subr.mxu0 %v298_v3  ;;  %586 = vmatprep.subr.mxu1 %v298_v3  ;;  %v294_v28 = vld [vmem:[#allocation5 + $0x30] sm:$0xff] }
  0xaf   :  { %v100_v34 = vmul.f32 0.0078125, %v70_v32  ;;  %v138_v35 = vmul.f32 %v793_v29, %v793_v29  ;;  %v108_v36 = vmul.f32 0.0078125, %v86_v33  ;;  %v139_v39 = vmul.f32 %v795_v30, %v795_v30  ;;  %536 = vmatpush3.msra.mxu0 %v298_v3  ;;  %602 = vmatpush3.msra.mxu1 %v298_v3  ;;  %v291_v32 = vld [vmem:[#allocation5 + $0x18] sm:$0xff]  ;;  %v290_v33 = vld [vmem:[#allocation5 + $0x10] sm:$0xff] }
  0xb1   :  { %v801_v37 = vsub.f32 %v51_v4, %v100_v34  ;;  %148 = vadd.xlane.f32.xlu0 %v131_v31  ;;  %162 = vadd.xlane.f32.xlu1 %v138_v35  ;;  %v803_v38 = vsub.f32 %v59_v5, %v108_v36  ;;  %v292_v31 = vld [vmem:[#allocation5 + $0x20] sm:$0xff]  ;;  %v289_v34 = vld [vmem:[#allocation5 + $0x8] sm:$0xff] }
  0xb2   :  { %v72_v40 = vpop.xlane.xlu0 %71  ;;  %v88_v41 = vpop.xlane.xlu1 %87  ;;  %v288_v35 = vld [vmem:[#allocation5] sm:$0xff] }
  0xb3   :  { %v101_v42 = vmul.f32 0.0078125, %v72_v40  ;;  %v132_v43 = vmul.f32 %v801_v37, %v801_v37  ;;  %v109_v44 = vmul.f32 0.0078125, %v88_v41  ;;  %v140_v47 = vmul.f32 %v803_v38, %v803_v38 }
  0xb5   :  { %v809_v45 = vsub.f32 %v52_v6, %v101_v42  ;;  %164 = vadd.xlane.f32.xlu1 %v139_v39  ;;  %150 = vadd.xlane.f32.xlu0 %v132_v43  ;;  %v811_v46 = vsub.f32 %v60_v7, %v109_v44 }
  0xb6   :  { %v74_v48 = vpop.xlane.xlu0 %73  ;;  %v90_v49 = vpop.xlane.xlu1 %89 }
  0xb7   :  { %v102_v51 = vmul.f32 0.0078125, %v74_v48  ;;  %v133_v52 = vmul.f32 %v809_v45, %v809_v45  ;;  %v110_v53 = vmul.f32 0.0078125, %v90_v49  ;;  %v141_v57 = vmul.f32 %v811_v46, %v811_v46 }
  0xb9   :  { %v818_v55 = vsub.f32 %v763_v8, %v102_v51  ;;  %166 = vadd.xlane.f32.xlu1 %v140_v47  ;;  %152 = vadd.xlane.f32.xlu0 %v133_v52  ;;  %v821_v56 = vsub.f32 %v765_v9, %v110_v53  ;;  %v297_v9 = vld [vmem:[#allocation5 + $0x48] sm:$0xff] }
  0xba   :  { %v76_v58 = vpop.xlane.xlu0 %75  ;;  %v92_v59 = vpop.xlane.xlu1 %91  ;;  %537 = vmatprep.subr.mxu0 %v297_v9  ;;  %587 = vmatprep.subr.mxu1 %v297_v9 }
  0xbb   :  { %v103_v60 = vmul.f32 0.0078125, %v76_v58  ;;  %v134_v61 = vmul.f32 %v818_v55, %v818_v55  ;;  %v111_v62 = vmul.f32 0.0078125, %v92_v59  ;;  %v142_v2 = vmul.f32 %v821_v56, %v821_v56  ;;  %538 = vmatpush3.msra.mxu0 %v297_v9  ;;  %603 = vmatpush3.msra.mxu1 %v297_v9 }
  0xbc   :  { %539 = vmatprep.subr.mxu0 %v296_v17  ;;  %588 = vmatprep.subr.mxu1 %v296_v17 }
  0xbd   :  { %v828_v0 = vsub.f32 %v769_v10, %v103_v60  ;;  %168 = vadd.xlane.f32.xlu1 %v141_v57  ;;  %154 = vadd.xlane.f32.xlu0 %v134_v61  ;;  %v831_v1 = vsub.f32 %v771_v11, %v111_v62 }
  0xbe   :  { %v78_v4 = vpop.xlane.xlu0 %77  ;;  %v94_v5 = vpop.xlane.xlu1 %93  ;;  %540 = vmatpush3.msra.mxu0 %v296_v17  ;;  %604 = vmatpush3.msra.mxu1 %v296_v17 }
  0xbf   :  { %v104_v6 = vmul.f32 0.0078125, %v78_v4  ;;  %v135_v7 = vmul.f32 %v828_v0, %v828_v0  ;;  %v112_v8 = vmul.f32 0.0078125, %v94_v5  ;;  %v143_v16 = vmul.f32 %v831_v1, %v831_v1 }
  0xc1   :  { %v838_v10 = vsub.f32 %v775_v12, %v104_v6  ;;  %170 = vadd.xlane.f32.xlu1 %v142_v2  ;;  %156 = vadd.xlane.f32.xlu0 %v135_v7  ;;  %v841_v11 = vsub.f32 %v777_v13, %v112_v8  ;;  %v295_v12 = vld [vmem:[#allocation5 + $0x38] sm:$0xff]  ;;  %v862_v6 = vld [vmem:[%s927_s1] ss:$0 sm:$0xff] }
  0xc2   :  { %v80_v18 = vpop.xlane.xlu0 %79  ;;  %v96_v19 = vpop.xlane.xlu1 %95  ;;  %541 = vmatprep.subr.mxu0 %v295_v12  ;;  %589 = vmatprep.subr.mxu1 %v295_v12 }
  0xc3   :  { %v105_v20 = vmul.f32 0.0078125, %v80_v18  ;;  %v136_v21 = vmul.f32 %v838_v10, %v838_v10  ;;  %v113_v24 = vmul.f32 0.0078125, %v96_v19  ;;  %v144_v26 = vmul.f32 %v841_v11, %v841_v11  ;;  %542 = vmatpush3.msra.mxu0 %v295_v12  ;;  %605 = vmatpush3.msra.mxu1 %v295_v12  ;;  %v868_v18 = vld [vmem:[%s928_s2] ss:$0 sm:$0xff] }
  0xc4   :  { %543 = vmatprep.subr.mxu0 %v294_v28  ;;  %590 = vmatprep.subr.mxu1 %v294_v28 }
  0xc5   :  { %v848_v13 = vsub.f32 %v781_v14, %v105_v20  ;;  %172 = vadd.xlane.f32.xlu1 %v143_v16  ;;  %158 = vadd.xlane.f32.xlu0 %v136_v21  ;;  %v851_v25 = vsub.f32 %v783_v15, %v113_v24  ;;  %v293_v15 = vld [vmem:[#allocation5 + $0x28] sm:$0xff] }
  0xc6   :  { %544 = vmatpush3.msra.mxu0 %v294_v28  ;;  %606 = vmatpush3.msra.mxu1 %v294_v28 }
  0xc7   :  { %v137_v27 = vmul.f32 %v848_v13, %v848_v13  ;;  %v145_v14 = vmul.f32 %v851_v25, %v851_v25  ;;  %545 = vmatprep.subr.mxu0 %v293_v15  ;;  %591 = vmatprep.subr.mxu1 %v293_v15 }
  0xc8   :  { %546 = vmatpush3.msra.mxu0 %v293_v15  ;;  %607 = vmatpush3.msra.mxu1 %v293_v15 }
  0xc9   :  { %174 = vadd.xlane.f32.xlu1 %v144_v26  ;;  %160 = vadd.xlane.f32.xlu0 %v137_v27 }
  0xca   :  { %547 = vmatprep.subr.mxu0 %v292_v31  ;;  %592 = vmatprep.subr.mxu1 %v292_v31 }
  0xcb   :  { %548 = vmatpush3.msra.mxu0 %v292_v31  ;;  %608 = vmatpush3.msra.mxu1 %v292_v31 }
  0xcc   :  { %549 = vmatprep.subr.mxu0 %v291_v32  ;;  %593 = vmatprep.subr.mxu1 %v291_v32 }
  0xcd   :  { %176 = vadd.xlane.f32.xlu1 %v145_v14  ;;  %550 = vmatpush3.msra.mxu0 %v291_v32 }
  0xce   :  { %551 = vmatprep.subr.mxu0 %v290_v33  ;;  %609 = vmatpush3.msra.mxu1 %v291_v32 }
  0xcf   :  { %552 = vmatpush3.msra.mxu0 %v290_v33  ;;  %594 = vmatprep.subr.mxu1 %v290_v33 }
  0xd0   :  { %553 = vmatprep.subr.mxu0 %v289_v34  ;;  %610 = vmatpush3.msra.mxu1 %v290_v33 }
  0xd1   :  { %554 = vmatpush3.msra.mxu0 %v289_v34  ;;  %595 = vmatprep.subr.mxu1 %v289_v34 }
  0xd2   :  { %555 = vmatprep.subr.mxu0 %v288_v35  ;;  %611 = vmatpush3.msra.mxu1 %v289_v34 }
  0xd3   :  { %556 = vmatpush3.msra.mxu0 %v288_v35  ;;  %596 = vmatprep.subr.mxu1 %v288_v35 }
  0xd4   :  { %612 = vmatpush3.msra.mxu1 %v288_v35 }
 0x136   :  { %v147_v36 = vpop.xlane.xlu0 %146 }
 0x137   :  { %v178_v39 = vmul.f32 0.0078125, %v147_v36 }
 0x139   :  { %v194_v40 = vadd.f32 1e-05, %v178_v39 }
 0x13a   :  { %v163_v41 = vpop.xlane.xlu1 %162  ;;  %v149_v42 = vpop.xlane.xlu0 %148 }
 0x13b   :  { %618 = vrsqrt.f32 %v194_v40  ;;  %v186_v43 = vmul.f32 0.0078125, %v163_v41  ;;  %v179_v44 = vmul.f32 0.0078125, %v149_v42 }
 0x13d   :  { %v202_v47 = vadd.f32 1e-05, %v186_v43  ;;  %v195_v48 = vadd.f32 1e-05, %v179_v44 }
 0x13e   :  { %v165_v49 = vpop.xlane.xlu1 %164  ;;  %v151_v50 = vpop.xlane.xlu0 %150 }
 0x13f   :  { %620 = vrsqrt.f32 %v202_v47  ;;  %v187_v51 = vmul.f32 0.0078125, %v165_v49  ;;  %v180_v52 = vmul.f32 0.0078125, %v151_v50 }
 0x140   :  { %622 = vrsqrt.f32 %v195_v48 }
 0x141   :  { %v203_v53 = vadd.f32 1e-05, %v187_v51  ;;  %v196_v54 = vadd.f32 1e-05, %v180_v52 }
 0x142   :  { %v167_v57 = vpop.xlane.xlu1 %166  ;;  %v153_v58 = vpop.xlane.xlu0 %152 }
 0x143   :  { %624 = vrsqrt.f32 %v203_v53  ;;  %v188_v59 = vmul.f32 0.0078125, %v167_v57  ;;  %v181_v60 = vmul.f32 0.0078125, %v153_v58 }
 0x144   :  { %626 = vrsqrt.f32 %v196_v54 }
 0x145   :  { %v204_v61 = vadd.f32 1e-05, %v188_v59  ;;  %v197_v62 = vadd.f32 1e-05, %v181_v60 }
 0x146   :  { %v169_v63 = vpop.xlane.xlu1 %168  ;;  %v155_v2 = vpop.xlane.xlu0 %154 }
 0x147   :  { %628 = vrsqrt.f32 %v204_v61  ;;  %v189_v3 = vmul.f32 0.0078125, %v169_v63  ;;  %v182_v4 = vmul.f32 0.0078125, %v155_v2 }
 0x148   :  { %v619_v5 = vpop.eup %618  ;;  %630 = vrsqrt.f32 %v197_v62 }
 0x149   :  { %v205_v7 = vadd.f32 1e-05, %v189_v3  ;;  %v198_v8 = vadd.f32 1e-05, %v182_v4  ;;  %v226_v9 = vmul.f32 %v619_v5, %v787_v22 }
 0x14a   :  { %v171_v16 = vpop.xlane.xlu1 %170  ;;  %v157_v17 = vpop.xlane.xlu0 %156 }
 0x14b   :  { %632 = vrsqrt.f32 %v205_v7  ;;  %v190_v19 = vmul.f32 0.0078125, %v171_v16  ;;  %v183_v20 = vmul.f32 0.0078125, %v157_v17  ;;  %v249_v21 = vmul.f32 %v862_v6, %v226_v9 }
 0x14c   :  { %v621_v24 = vpop.eup %620  ;;  %634 = vrsqrt.f32 %v198_v8 }
 0x14d   :  { %v623_v12 = vpop.eup %622  ;;  %v206_v26 = vadd.f32 1e-05, %v190_v19  ;;  %v199_v27 = vadd.f32 1e-05, %v183_v20  ;;  %v272_v28 = vadd.f32 %v868_v18, %v249_v21  ;;  %v234_v22 = vmul.f32 %v621_v24, %v793_v29 }
 0x14e   :  { %v173_v14 = vpop.xlane.xlu1 %172  ;;  %v159_v15 = vpop.xlane.xlu0 %158  ;;  %v227_v31 = vmul.f32 %v623_v12, %v789_v23 }
 0x14f   :  { %636 = vrsqrt.f32 %v206_v26  ;;  %v191_v32 = vmul.f32 0.0078125, %v173_v14  ;;  %v184_v33 = vmul.f32 0.0078125, %v159_v15  ;;  %557 = vmatprep.mubr.f32.mxu0 %v272_v28  ;;  %v257_v34 = vmul.f32 %v862_v6, %v234_v22 }
 0x150   :  { %v625_v35 = vpop.eup %624  ;;  %638 = vrsqrt.f32 %v199_v27  ;;  %v250_v36 = vmul.f32 %v862_v6, %v227_v31 }
 0x151   :  { %v627_v39 = vpop.eup %626  ;;  %v207_v40 = vadd.f32 1e-05, %v191_v32  ;;  %v200_v41 = vadd.f32 1e-05, %v184_v33  ;;  %v280_v42 = vadd.f32 %v868_v18, %v257_v34  ;;  %v235_v29 = vmul.f32 %v625_v35, %v795_v30 }
 0x152   :  { %v175_v43 = vpop.xlane.xlu1 %174  ;;  %v161_v44 = vpop.xlane.xlu0 %160  ;;  %v273_v23 = vadd.f32 %v868_v18, %v250_v36  ;;  %v228_v47 = vmul.f32 %v627_v39, %v801_v37 }
 0x153   :  { %640 = vrsqrt.f32 %v207_v40  ;;  %v192_v48 = vmul.f32 0.0078125, %v175_v43  ;;  %v185_v49 = vmul.f32 0.0078125, %v161_v44  ;;  %569 = vmatprep.mubr.f32.mxu1 %v280_v42  ;;  %v258_v50 = vmul.f32 %v862_v6, %v235_v29 }
 0x154   :  { %v629_v51 = vpop.eup %628  ;;  %642 = vrsqrt.f32 %v200_v41  ;;  %558 = vmatmul.mubr.f32.vlgmr.msra.gmra.mxu0 %v273_v23  ;;  %v251_v52 = vmul.f32 %v862_v6, %v228_v47 }
 0x155   :  { %v631_v53 = vpop.eup %630  ;;  %v208_v54 = vadd.f32 1e-05, %v192_v48  ;;  %v201_v30 = vadd.f32 1e-05, %v185_v49  ;;  %v281_v57 = vadd.f32 %v868_v18, %v258_v50  ;;  %v236_v58 = vmul.f32 %v629_v51, %v803_v38 }
 0x156   :  { %v177_v59 = vpop.xlane.xlu1 %176  ;;  %v274_v37 = vadd.f32 %v868_v18, %v251_v52  ;;  %v229_v60 = vmul.f32 %v631_v53, %v809_v45 }
 0x157   :  { %644 = vrsqrt.f32 %v208_v54  ;;  %v193_v61 = vmul.f32 0.0078125, %v177_v59  ;;  %570 = vmatmul.mubr.f32.vlgmr.msra.gmra.mxu1 %v281_v57  ;;  %v259_v62 = vmul.f32 %v862_v6, %v236_v58 }
 0x158   :  { %v633_v63 = vpop.eup %632  ;;  %646 = vrsqrt.f32 %v201_v30  ;;  %560 = vmatprep.mubr.f32.mxu0 %v274_v37  ;;  %v252_v2 = vmul.f32 %v862_v6, %v229_v60 }
 0x159   :  { %v635_v3 = vpop.eup %634  ;;  %v209_v4 = vadd.f32 1e-05, %v193_v61  ;;  %v282_v5 = vadd.f32 %v868_v18, %v259_v62  ;;  %v237_v38 = vmul.f32 %v633_v63, %v811_v46 }
 0x15a   :  { %v275_v7 = vadd.f32 %v868_v18, %v252_v2  ;;  %v230_v45 = vmul.f32 %v635_v3, %v818_v55 }
 0x15b   :  { %648 = vrsqrt.f32 %v209_v4  ;;  %572 = vmatprep.mubr.f32.mxu1 %v282_v5  ;;  %v260_v8 = vmul.f32 %v862_v6, %v237_v38 }
 0x15c   :  { %v637_v9 = vpop.eup %636  ;;  %561 = vmatmul.mubr.f32.gmra.mxu0 %v275_v7  ;;  %v253_v16 = vmul.f32 %v862_v6, %v230_v45 }
 0x15d   :  { %v639_v17 = vpop.eup %638  ;;  %v283_v19 = vadd.f32 %v868_v18, %v260_v8  ;;  %v238_v20 = vmul.f32 %v637_v9, %v821_v56 }
 0x15e   :  { %v276_v21 = vadd.f32 %v868_v18, %v253_v16  ;;  %v231_v46 = vmul.f32 %v639_v17, %v828_v0 }
 0x15f   :  { %573 = vmatmul.mubr.f32.gmra.mxu1 %v283_v19  ;;  %v261_v55 = vmul.f32 %v862_v6, %v238_v20 }
 0x160   :  { %v641_v24 = vpop.eup %640  ;;  %563 = vmatprep.mubr.f32.mxu0 %v276_v21  ;;  %v254_v12 = vmul.f32 %v862_v6, %v231_v46 }
 0x161   :  { %v643_v26 = vpop.eup %642  ;;  %v284_v27 = vadd.f32 %v868_v18, %v261_v55  ;;  %v239_v28 = vmul.f32 %v641_v24, %v831_v1 }
 0x162   :  { %v277_v22 = vadd.f32 %v868_v18, %v254_v12  ;;  %v232_v56 = vmul.f32 %v643_v26, %v838_v10 }
 0x163   :  { %575 = vmatprep.mubr.f32.mxu1 %v284_v27  ;;  %v262_v14 = vmul.f32 %v862_v6, %v239_v28 }
 0x164   :  { %v645_v0 = vpop.eup %644  ;;  %564 = vmatmul.mubr.f32.gmra.mxu0 %v277_v22  ;;  %v255_v15 = vmul.f32 %v862_v6, %v232_v56 }
 0x165   :  { %v647_v31 = vpop.eup %646  ;;  %v285_v32 = vadd.f32 %v868_v18, %v262_v14  ;;  %v240_v33 = vmul.f32 %v645_v0, %v841_v11 }
 0x166   :  { %v278_v34 = vadd.f32 %v868_v18, %v255_v15  ;;  %v233_v1 = vmul.f32 %v647_v31, %v848_v13  ;;  %v492_v13 = vld [vmem:[%s930_s4] ss:$0 sm:$0xff]  ;;  %s720_s4 = smov [#allocation7]  }
 0x167   :  { %576 = vmatmul.mubr.f32.gmra.mxu1 %v285_v32  ;;  %v263_v35 = vmul.f32 %v862_v6, %v240_v33  ;;  %s477_s7 = sshll.u32 %s720_s4, 4  ;;  %s478_s7 = int_to_ptr.vmem [resolvable:$true] %s477_s7 }
 0x168   :  { %v649_v10 = vpop.eup %648  ;;  %566 = vmatprep.mubr.f32.mxu0 %v278_v34  ;;  %v256_v36 = vmul.f32 %v862_v6, %v233_v1  ;;  %s690_s8 = scalar_lea.vmem %s478_s7, 2048  ;;  %p695_p11 = scmp.lt.s32.totalorder %s478_s7, %s478_s7 }
 0x169   :  { %v286_v39 = vadd.f32 %v868_v18, %v263_v35  ;;  %v241_v40 = vmul.f32 %v649_v10, %v851_v25  ;;  %p691_p10 = scmp.ne.s32.totalorder %s478_s7, %s690_s8  ;;  %p696_p12 = scmp.lt.s32.totalorder %s690_s8, %s690_s8 }
 0x16a   :  { %v279_v41 = vadd.f32 %v868_v18, %v256_v36 }
 0x16b   :  { %578 = vmatprep.mubr.f32.mxu1 %v286_v39  ;;  %v264_v11 = vmul.f32 %v862_v6, %v241_v40  ;;  %p697_p13 = por %p696_p12, %p695_p11 }
 0x16c   :  { %567 = vmatmul.mubr.f32.gmra.mxu0 %v279_v41 }
 0x16d   :  { %v287_v42 = vadd.f32 %v868_v18, %v264_v11  ;;  %p698_p0 = pnand %p697_p13, %p691_p10 }
 0x16f   :  { %579 = vmatmul.mubr.f32.gmra.mxu1 %v287_v42 }
 0x214   :  { %v559_v29 = vpop.f32.mrf.mxu0 }
 0x215   :  { %v383_v43 = vadd.f32 %v559_v29, %v492_v13 }
 0x216   :  { %v377_v44 = vpop.f32.mrf.mxu0 }
 0x217   :  { %457 = vst [vmem:[#allocation7 + $0x8] sm:$0xff] %v383_v43  ;;  %v378_v23 = vadd.f32 %v492_v13, %v377_v44  ;;  %v571_v47 = vpop.f32.mrf.mxu1 }
 0x218   :  { %v423_v25 = vadd.f32 %v571_v47, %v492_v13 }
 0x219   :  { %456 = vst [vmem:[#allocation7] sm:$0xff] %v378_v23  ;;  %v417_v48 = vpop.f32.mrf.mxu1 }
 0x21a   :  { %465 = vst [vmem:[#allocation7 + $0x48] sm:$0xff] %v423_v25  ;;  %v418_v49 = vadd.f32 %v492_v13, %v417_v48 }
 0x21c   :  { %464 = vst [vmem:[#allocation7 + $0x40] sm:$0xff] %v418_v49  ;;  %v562_v6 = vpop.f32.mrf.mxu0 }
 0x21d   :  { %v393_v50 = vadd.f32 %v562_v6, %v492_v13 }
 0x21e   :  { %v387_v18 = vpop.f32.mrf.mxu0 }
 0x21f   :  { %459 = vst [vmem:[#allocation7 + $0x18] sm:$0xff] %v393_v50  ;;  %v388_v51 = vadd.f32 %v492_v13, %v387_v18  ;;  %v574_v52 = vpop.f32.mrf.mxu1 }
 0x220   :  { %v433_v53 = vadd.f32 %v574_v52, %v492_v13 }
 0x221   :  { %458 = vst [vmem:[#allocation7 + $0x10] sm:$0xff] %v388_v51  ;;  %v427_v54 = vpop.f32.mrf.mxu1 }
 0x222   :  { %467 = vst [vmem:[#allocation7 + $0x58] sm:$0xff] %v433_v53  ;;  %v428_v30 = vadd.f32 %v492_v13, %v427_v54 }
 0x224   :  { %466 = vst [vmem:[#allocation7 + $0x50] sm:$0xff] %v428_v30  ;;  %v565_v57 = vpop.f32.mrf.mxu0 }
 0x225   :  { %v403_v58 = vadd.f32 %v565_v57, %v492_v13 }
 0x226   :  { %v397_v59 = vpop.f32.mrf.mxu0 }
 0x227   :  { %461 = vst [vmem:[#allocation7 + $0x28] sm:$0xff] %v403_v58  ;;  %v398_v37 = vadd.f32 %v492_v13, %v397_v59  ;;  %v577_v60 = vpop.f32.mrf.mxu1 }
 0x228   :  { %v443_v61 = vadd.f32 %v577_v60, %v492_v13 }
 0x229   :  { %460 = vst [vmem:[#allocation7 + $0x20] sm:$0xff] %v398_v37  ;;  %v437_v62 = vpop.f32.mrf.mxu1 }
 0x22a   :  { %469 = vst [vmem:[#allocation7 + $0x68] sm:$0xff] %v443_v61  ;;  %v438_v63 = vadd.f32 %v492_v13, %v437_v62 }
 0x22c   :  { %468 = vst [vmem:[#allocation7 + $0x60] sm:$0xff] %v438_v63  ;;  %v568_v2 = vpop.f32.mrf.mxu0 }
 0x22d   :  { %v413_v3 = vadd.f32 %v568_v2, %v492_v13 }
 0x22e   :  { %v407_v4 = vpop.f32.mrf.mxu0 }
 0x22f   :  { %463 = vst [vmem:[#allocation7 + $0x38] sm:$0xff] %v413_v3  ;;  %v408_v5 = vadd.f32 %v492_v13, %v407_v4  ;;  %v580_v38 = vpop.f32.mrf.mxu1 }
 0x230   :  { %v453_v7 = vadd.f32 %v580_v38, %v492_v13 }
 0x231   :  { %462 = vst [vmem:[#allocation7 + $0x30] sm:$0xff] %v408_v5  ;;  %v447_v45 = vpop.f32.mrf.mxu1 }
 0x232   :  { %471 = vst [vmem:[#allocation7 + $0x78] sm:$0xff] %v453_v7  ;;  %v448_v8 = vadd.f32 %v492_v13, %v447_v45 }
 0x234   :  { %470 = vst [vmem:[#allocation7 + $0x70] sm:$0xff] %v448_v8 }
 0x235   :  { %701 = shalt.err (!%p698_p0)
}
 0x236   :  { %483 = dma.vmem_to_hbm [thread:$0]  %s478_s7, 2048, %s931_s5, [#allocation4], %s717_s21, %s717_s21, %s718_s22  }
 0x237   :  { %714 = dma.done.wait [#allocation4], 2048  }
 0x238   :  { %715 = vsyncadd [#allocation4], 4294965248 }
 0x239   :  { %487 = vsyncpa [#allocation3], 1 }
 0x23a   :  { %488 = vsyncpa [#allocation6], 1 }
 0x23b   :  { %489 = vsyncpa [#allocation4], 1 }

</bundles_post_ra>
